<compile_context>
chip_gen: v5e
topology: v5e:2x2
jax: 0.10.0
libtpu: 0.0.40
codegen_flags: <defaults>
</compile_context>

<pallas_src>
import jax
import jax.numpy as jnp
from jax.experimental import pallas as pl
from jax.experimental.pallas import tpu as pltpu

SPLIT = 988  # first 988 features become the (1, 52, 19) image plane

# Per-step double-buffered working-set budget.  16 MiB == v5e's default scoped
# VMEM limit; safe on every generation (v6e/v7x have >= 32 MiB scoped).
_VMEM_BUDGET_BYTES = 16 * 1024 * 1024
_MAX_TILE_B = 1024   # diminishing returns past ~512-1024 rows
_MIN_STEPS = 8       # grid-length floor: pipelining + v7x dual-TC sharding


def _sublane_pack(itemsize: int) -> int:
    # Sub-32-bit dtypes pack along sublanes: 8 rows (4B), 16 (2B), 32 (1B).
    return max(8, 32 // max(1, itemsize))


def _pick_tile_b(B: int, F: int, itemsize: int) -> int:
    """Balanced, sublane-aligned batch tile giving >= _MIN_STEPS grid steps."""
    pack = _sublane_pack(itemsize)
    if B <= pack:
        # Tiny batch: single full-dim block (always a legal block shape).
        return B

    # VMEM cap: double-buffered input (F) + head (SPLIT) + tail (F-SPLIT)
    # ~= 4*F bytes per row per step.
    bytes_per_row = 4 * F * itemsize
    cap = _VMEM_BUDGET_BYTES // max(1, bytes_per_row)
    cap = min(cap, _MAX_TILE_B)
    # Never fall back to the whole batch for very wide F; pack rows is the
    # floor (vmem_limit_bytes below covers the working set if it overshoots).
    cap = max(pack, (cap // pack) * pack)

    # Target >= _MIN_STEPS balanced steps (each still moving >= ~100s of KiB
    # at F ~ 1K, so the ~0.35us/step overhead stays negligible).
    steps = max(_MIN_STEPS, pl.cdiv(B, cap))
    tile = pl.cdiv(B, steps)
    tile = pl.cdiv(tile, pack) * pack   # round UP to sublane packing
    tile = min(tile, cap)
    tile = max(tile, pack)
    if tile >= B:
        return B
    return tile


def _decom_kernel(x_ref, head_ref, tail_ref):
    # Store directly from ref slices: no full (TILE_B, F) tile held in vregs.
    head_ref[...] = x_ref[:, :SPLIT]
    tail_ref[...] = x_ref[:, SPLIT:]


def decom_layer(x):
    """JAX/Pallas equivalent of the PyTorch decom_layer.forward."""
    B, F = x.shape
    assert F > SPLIT, f"feature dim must exceed {SPLIT}, got {F}"
    tail_len = F - SPLIT
    itemsize = jnp.dtype(x.dtype).itemsize

    tile_b = _pick_tile_b(B, F, itemsize)
    grid = (pl.cdiv(B, tile_b),)

    # Double-buffered working set (input + both outputs) plus headroom; keep
    # under v7x's 64 MiB physical VMEM.  For typical F ~ 1K this stays at the
    # 16 MiB floor (== v5e default scoped limit).
    working = 4 * tile_b * F * itemsize
    vmem_limit = int(min(max(2 * working + (1 << 20), 16 << 20), 60 << 20))

    head, tail = pl.pallas_call(
        _decom_kernel,
        out_shape=(
            jax.ShapeDtypeStruct((B, SPLIT), x.dtype),
            jax.ShapeDtypeStruct((B, tail_len), x.dtype),
        ),
        grid=grid,
        in_specs=[pl.BlockSpec((tile_b, F), lambda i: (i, 0))],
        out_specs=(
            pl.BlockSpec((tile_b, SPLIT), lambda i: (i, 0)),
            pl.BlockSpec((tile_b, tail_len), lambda i: (i, 0)),
        ),
        compiler_params=pltpu.CompilerParams(
            dimension_semantics=("parallel",),
            vmem_limit_bytes=vmem_limit,
        ),
        cost_estimate=pl.CostEstimate(
            flops=0,
            transcendentals=0,
            bytes_accessed=2 * B * F * itemsize,
        ),
    )(x)

    # Required by the module's return signature; see TODO(synk) in the header
    # about fusing/eliding this relayout in production.
    return head.reshape(B, 1, 52, 19), tail


if __name__ == "__main__":
    key = jax.random.PRNGKey(0)
    B, F = 2, 1024  # small shape consistent with the forward (F > 988)
    x = jax.random.normal(key, (B, F), dtype=jnp.float32)

    img, rest = decom_layer(x)
    jax.block_until_ready((img, rest))

    # Sanity check against the pure-JAX reference semantics.
    ref_img = x[:, :SPLIT].reshape(B, 1, 52, 19)
    ref_rest = x[:, SPLIT:]
    assert img.shape == (B, 1, 52, 19)
    assert rest.shape == (B, F - SPLIT)
    assert jnp.array_equal(img, ref_img)
    assert jnp.array_equal(rest, ref_rest)

    # Exercise the tiled, multi-step grid path (balanced ragged final block).
    B2, F2 = 300, 1100
    x2 = jax.random.normal(jax.random.PRNGKey(1), (B2, F2), dtype=jnp.float32)
    img2, rest2 = decom_layer(x2)
    jax.block_until_ready((img2, rest2))
    assert jnp.array_equal(img2, x2[:, :SPLIT].reshape(B2, 1, 52, 19))
    assert jnp.array_equal(rest2, x2[:, SPLIT:])

    print("KERNEL_OK")
</pallas_src>

<mosaic_0001>
module attributes {stable_mosaic.version = 11 : i64} {
  func.func @_decom_kernel(%arg0: i32, %arg1: memref<2x1024xf32, #tpu.memory_space<vmem>>, %arg2: memref<2x988xf32, #tpu.memory_space<vmem>>, %arg3: memref<2x36xf32, #tpu.memory_space<vmem>>) attributes {dimension_semantics = [#tpu.dimension_semantics<parallel>], iteration_bounds = array<i64: 1>, scalar_prefetch = 0 : i64, scratch_operands = 0 : i64, tpu.core_type = #tpu.core_type<tc>, window_params = [{transform_indices = @transform_0, window_bounds = array<i64: 2, 1024>}, {transform_indices = @transform_1, window_bounds = array<i64: 2, 988>}, {transform_indices = @transform_2, window_bounds = array<i64: 2, 36>}]} {
    %c0 = arith.constant 0 : index
    %c0_0 = arith.constant 0 : index
    %0 = vector.load %arg1[%c0, %c0_0] : memref<2x1024xf32, #tpu.memory_space<vmem>>, vector<2x988xf32>
    %c0_1 = arith.constant 0 : index
    %c0_2 = arith.constant 0 : index
    %1 = vector.load %arg2[%c0_1, %c0_2] : memref<2x988xf32, #tpu.memory_space<vmem>>, vector<2x988xf32>
    tpu.vector_store %arg2[%c0_1, %c0_2], %0 {strides = array<i32>} : memref<2x988xf32, #tpu.memory_space<vmem>>, vector<2x988xf32>,
    %c0_3 = arith.constant 0 : index
    %c988 = arith.constant 988 : index
    %2 = vector.load %arg1[%c0_3, %c988] : memref<2x1024xf32, #tpu.memory_space<vmem>>, vector<2x36xf32>
    %c0_4 = arith.constant 0 : index
    %c0_5 = arith.constant 0 : index
    %3 = vector.load %arg3[%c0_4, %c0_5] : memref<2x36xf32, #tpu.memory_space<vmem>>, vector<2x36xf32>
    tpu.vector_store %arg3[%c0_4, %c0_5], %2 {strides = array<i32>} : memref<2x36xf32, #tpu.memory_space<vmem>>, vector<2x36xf32>,
    return
  }
  func.func @transform_0(%arg0: i32) -> (i32, i32) {
    %c0_i32 = arith.constant 0 : i32
    %c0_i32_0 = arith.constant 0 : i32
    return %arg0, %c0_i32 : i32, i32
  }
  func.func @transform_1(%arg0: i32) -> (i32, i32) {
    %c0_i32 = arith.constant 0 : i32
    %c0_i32_0 = arith.constant 0 : i32
    return %arg0, %c0_i32 : i32, i32
  }
  func.func @transform_2(%arg0: i32) -> (i32, i32) {
    %c0_i32 = arith.constant 0 : i32
    %c0_i32_0 = arith.constant 0 : i32
    return %arg0, %c0_i32 : i32, i32
  }
}

</mosaic_0001>

<bundles_post_ra>
// kernel: tpu_custom_call.1
= control target key start
LH: loop header
LB: loop body
LE: loop exit
PB: predicated region body
PF: predicated region fallthrough
CT: control target
= control target key end

     0   :  { %8 = vsyncpa [#allocation3], 0  ;;  %s189_s0 = inlined_call_operand.hbm [shape: f32[2,1024], index: 0, kind: input, shape index: {}]   ;;  %s190_s1 = inlined_call_operand.hbm [shape: f32[2,988], index: 1, kind: output, shape index: {0}]   ;;  %s191_s2 = inlined_call_operand.hbm [shape: f32[2,36], index: 2, kind: output, shape index: {1}]  }
   0x1   :  { %9 = vsyncpa [#allocation4], 0 }
   0x2   :  { %10 = vsyncpa [#allocation7], 0  ;;  %s16_s11 = sshll.u32 %s189_s0, 4  ;;  %s161_s12 = smov [#allocation2]   ;;  %s17_s11 = int_to_ptr.hbm [resolvable:$true] %s16_s11 }
   0x3   :  { %s18_s13 = sshll.u32 %s161_s12, 4  ;;  %s19_s13 = int_to_ptr.vmem [resolvable:$true] %s18_s13 }
   0x4   :  { %21 = dma.hbm_to_vmem [thread:$0]  %s17_s11, 256, %s19_s13, [#allocation3]  }
   0x5   :  { %155 = dma.done.wait [#allocation3], 256  }
   0x6   :  { %156 = vsyncadd [#allocation3], 4294967040  ;;  %v37_v0 = vld [vmem:[#allocation2 + $0xe] sm:$0x3]  ;;  %s162_s14 = smov 36   ;;  %vm29_vm0 = vcmask 1041408  }
   0x7   :  { %39 = vst [vmem:[#allocation1] ss:$4 sm:$0xff] %v37_v0  ;;  %vm30_vm1 = vcmask 1043458   ;;  %s163_s15 = smov [#allocation5]   ;;  %s53_s0 = sshll.u32 %s190_s1, 4  ;;  %vm32_vm3 = vcmask 1045508   ;;  %s54_s0 = int_to_ptr.hbm [resolvable:$true] %s53_s0 }
   0x8   :  { %s51_s16 = sshll.u32 %s163_s15, 4  ;;  %vm31_vm2 = vmor %vm30_vm1, %vm29_vm0  ;;  %vm34_vm5 = vcmask 752646   ;;  %v26_v2 = vld [vmem:[#allocation2] sm:$0xff]  ;;  %v27_v3 = vld [vmem:[#allocation2 + $0x8] sm:$0xff]  ;;  %s164_s19 = smov [#allocation6]   ;;  %vm44_vm7 = vcmask 287744   ;;  %s52_s16 = int_to_ptr.vmem [resolvable:$true] %s51_s16 }
   0x9   :  { %vm33_vm4 = vmor %vm32_vm3, %vm31_vm2  ;;  %28 = vst [vmem:[#allocation5] sm:$0xff] %v26_v2  ;;  %s62_s20 = sshll.u32 %s164_s19, 4  ;;  %s64_s23 = sshll.u32 %s191_s2, 4  ;;  %s63_s20 = int_to_ptr.vmem [resolvable:$true] %s62_s20  ;;  %s65_s23 = int_to_ptr.hbm [resolvable:$true] %s64_s23 }
   0xa   :  { %vm35_vm6 = vmor %vm34_vm5, %vm33_vm4 }
   0xb   :  { %36 = vst.msk [vmem:[#allocation5 + $0x8] sm:$0xff] %vm35_vm6, %v27_v3 }
   0xc   :  { %56 = dma.vmem_to_hbm [thread:$0]  %s52_s16, 256, %s54_s0, [#allocation4]  }
   0xe   :  { %v40_v1 = vld.sshfl [vmem:[#allocation1] sm:$0xff pattern:$0x73625140] }
   0xf   :  { %41 = vrot.lane.b32.xlu0 %v40_v1, %s162_s14 }
  0x81   :  { %v42_v4 = vpop.permute.xlu0 %41 }
  0x82   :  { %45 = vst.msk [vmem:[#allocation6] sm:$0x3] %vm44_vm7, %v42_v4 }
  0x83   :  { %67 = dma.vmem_to_hbm [thread:$0]  %s63_s20, 32, %s65_s23, [#allocation7]  }
  0x84   :  { %157 = dma.done.wait [#allocation4], 256  }
  0x85   :  { %158 = vsyncadd [#allocation4], 4294967040 }
  0x86   :  { %159 = dma.done.wait [#allocation7], 32  }
  0x87   :  { %160 = vsyncadd [#allocation7], 4294967264 }
  0x88   :  { %76 = vsyncpa [#allocation3], 1 }
  0x89   :  { %77 = vsyncpa [#allocation4], 1 }
  0x8a   :  { %78 = vsyncpa [#allocation7], 1 }

</bundles_post_ra>
